<compile_context>
chip_gen: v6e
topology: v6e:2x2x1
jax: 0.10.0
libtpu: 0.0.40
codegen_flags: <defaults>
</compile_context>

<pallas_src>
import functools

import numpy as np
import jax
import jax.numpy as jnp
from jax.experimental import pallas as pl
from jax.experimental.pallas import tpu as pltpu


# ----------------------------------------------------------------------------
# Kernels
# ----------------------------------------------------------------------------
def _xw_kernel(x_ref, w_ref, o_ref):
    """One row tile of XW = X @ W (bf16 in, f32 MXU accumulate, bf16 out)."""
    o_ref[...] = jnp.dot(x_ref[...], w_ref[...],
                         preferred_element_type=jnp.float32).astype(o_ref.dtype)


def _make_gcn_a_kernel(tk: int, xw_resident: bool):
    """relu(A @ XW + b): one (row-tile i, nonzero-block j) step."""

    def kernel(cols_ref, nnz_ref, a_ref, xw_ref, b_ref, out_ref, acc_ref):
        i = pl.program_id(0)
        j = pl.program_id(1)

        @pl.when(j == 0)
        def _():
            acc_ref[...] = jnp.zeros_like(acc_ref)

        # Only the first nnz[i] entries of cols[i, :] are real nonzero block columns.
        @pl.when(j < nnz_ref[i])
        def _():
            if xw_resident:
                k = cols_ref[i, j]
                start = pl.multiple_of(k * tk, tk)
                xw = xw_ref[pl.ds(start, tk), :]
            else:
                xw = xw_ref[...]
            acc_ref[...] += jnp.dot(a_ref[...], xw,
                                    preferred_element_type=jnp.float32)

        @pl.when(j == pl.num_programs(1) - 1)
        def _():
            h = acc_ref[...] + b_ref[...]                 # f32 epilogue on the VPU
            out_ref[...] = jnp.maximum(h, 0.0).astype(out_ref.dtype)

    return kernel


def _make_head_kernel(num_classes: int):
    """pool @ H2 accumulated over node tiles, then FC + masked log_softmax."""

    def kernel(pool_ref, h_ref, wf_ref, bf_ref, out_ref, acc_ref):
        k = pl.program_id(0)

        @pl.when(k == 0)
        def _():
            acc_ref[...] = jnp.zeros_like(acc_ref)

        acc_ref[...] += jnp.dot(pool_ref[...], h_ref[...],
                                preferred_element_type=jnp.float32)

        @pl.when(k == pl.num_programs(0) - 1)
        def _():
            pooled = acc_ref[...].astype(jnp.bfloat16)    # (G_pad, H_pad)
            logits = jnp.dot(pooled, wf_ref[...],
                             preferred_element_type=jnp.float32) + bf_ref[...]
            # log_softmax over the real classes only (lanes >= num_classes are padding)
            lane = jax.lax.broadcasted_iota(jnp.int32, logits.shape, 1)
            valid = lane < num_classes
            lm = jnp.where(valid, logits, -1e30)
            m = jnp.max(lm, axis=1, keepdims=True)
            s = lm - m
            e = jnp.where(valid, jnp.exp(s), 0.0)
            lse = jnp.log(jnp.sum(e, axis=1, keepdims=True))
            out_ref[...] = s - lse

    return kernel


# ----------------------------------------------------------------------------
# Pallas wrappers
# ----------------------------------------------------------------------------
def _round_up(x: int, m: int) -> int:
    return (x + m - 1) // m * m


def _pad2(x, rows, cols):
    return jnp.pad(x, ((0, rows - x.shape[0]), (0, cols - x.shape[1])))


def xw_matmul(x_bf16, w_bf16, *, tm):
    """XW = X @ W, tiled over rows of X (hoisted out of the A kernel)."""
    n_pad, f_pad = x_bf16.shape
    h_pad = w_bf16.shape[1]
    num_i = n_pad // tm

    vmem_need = (2 * tm * f_pad * 2 + 2 * f_pad * h_pad * 2 + 2 * tm * h_pad * 2)
    vmem_limit = max(vmem_need + (2 << 20), 16 * 1024 * 1024)

    return pl.pallas_call(
        _xw_kernel,
        out_shape=jax.ShapeDtypeStruct((n_pad, h_pad), jnp.bfloat16),
        grid_spec=pltpu.PrefetchScalarGridSpec(
            num_scalar_prefetch=0,
            grid=(num_i,),
            in_specs=[
                pl.BlockSpec((tm, f_pad), lambda i: (i, 0)),
                pl.BlockSpec((f_pad, h_pad), lambda i: (0, 0)),   # W resident
            ],
            out_specs=pl.BlockSpec((tm, h_pad), lambda i: (i, 0)),
        ),
        compiler_params=pltpu.CompilerParams(
            dimension_semantics=("parallel",),
            vmem_limit_bytes=vmem_limit),
        cost_estimate=pl.CostEstimate(
            flops=2 * n_pad * f_pad * h_pad, transcendentals=0,
            bytes_accessed=n_pad * f_pad * 2 + f_pad * h_pad * 2 + n_pad * h_pad * 2),
    )(x_bf16, w_bf16)


def gcn_a_layer(a_bf16, cols, nnz, xw_bf16, b_f32, *, tm, tk):
    """relu(A @ XW + b) with index-map-level skipping of zero A tiles."""
    n_pad = a_bf16.shape[0]
    h_pad = xw_bf16.shape[1]
    num_i = n_pad // tm
    max_nnz = cols.shape[1]

    xw_bytes = n_pad * h_pad * 2
    xw_resident = xw_bytes <= (12 << 20)   # keep XW in VMEM when it fits (all gens)

    if xw_resident:
        xw_spec = pl.BlockSpec((n_pad, h_pad), lambda i, j, cols, nnz: (0, 0))
        xw_buf = 2 * xw_bytes
    else:
        # Column tile of XW selected by the same compressed block-column id.
        xw_spec = pl.BlockSpec((tk, h_pad), lambda i, j, cols, nnz: (cols[i, j], 0))
        xw_buf = 2 * tk * h_pad * 2

    vmem_need = (2 * tm * tk * 2 + xw_buf + 2 * h_pad * 4
                 + 2 * tm * h_pad * 2 + tm * h_pad * 4)
    vmem_limit = min(max(vmem_need + (8 << 20), 32 << 20), 60 << 20)

    flops = 2 * num_i * max_nnz * tm * tk * h_pad
    bytes_accessed = (num_i * max_nnz * tm * tk * 2 + xw_bytes
                      + n_pad * h_pad * 2 + h_pad * 4)

    grid_spec = pltpu.PrefetchScalarGridSpec(
        num_scalar_prefetch=2,
        grid=(num_i, max_nnz),
        in_specs=[
            # A tile: block column chosen by compressed nonzero index -> zero tiles
            # are never DMA'd (padding repeats the last valid id, deduped fetch).
            pl.BlockSpec((tm, tk), lambda i, j, cols, nnz: (i, cols[i, j])),
            xw_spec,
            pl.BlockSpec((1, h_pad), lambda i, j, cols, nnz: (0, 0)),   # bias resident
        ],
        out_specs=pl.BlockSpec((tm, h_pad), lambda i, j, cols, nnz: (i, 0)),
        scratch_shapes=[pltpu.VMEM((tm, h_pad), jnp.float32)],
    )
    return pl.pallas_call(
        _make_gcn_a_kernel(tk, xw_resident),
        out_shape=jax.ShapeDtypeStruct((n_pad, h_pad), jnp.bfloat16),
        grid_spec=grid_spec,
        compiler_params=pltpu.CompilerParams(
            dimension_semantics=("parallel", "arbitrary"),
            vmem_limit_bytes=vmem_limit),
        cost_estimate=pl.CostEstimate(flops=flops, transcendentals=0,
                                      bytes_accessed=bytes_accessed),
    )(cols, nnz, a_bf16, xw_bf16, b_f32)


def gcn_head(pool_bf16, h2_bf16, wf_bf16, bf_f32, num_classes, *, tk):
    g_pad, n_pad = pool_bf16.shape
    h_pad = h2_bf16.shape[1]
    c_pad = wf_bf16.shape[1]
    num_k = n_pad // tk

    vmem_need = (2 * g_pad * tk * 2 + 2 * tk * h_pad * 2 + 2 * h_pad * c_pad * 2
                 + 2 * c_pad * 4 + 2 * g_pad * c_pad * 4 + g_pad * h_pad * 4)
    vmem_limit = max(2 * vmem_need + (1 << 20), 16 * 1024 * 1024)

    grid_spec = pltpu.PrefetchScalarGridSpec(
        num_scalar_prefetch=0,
        grid=(num_k,),
        in_specs=[
            pl.BlockSpec((g_pad, tk), lambda k: (0, k)),           # pool columns
            pl.BlockSpec((tk, h_pad), lambda k: (k, 0)),           # H2 rows
            pl.BlockSpec((h_pad, c_pad), lambda k: (0, 0)),        # Wf (resident)
            pl.BlockSpec((1, c_pad), lambda k: (0, 0)),            # bf (resident)
        ],
        out_specs=pl.BlockSpec((g_pad, c_pad), lambda k: (0, 0)),
        scratch_shapes=[pltpu.VMEM((g_pad, h_pad), jnp.float32)],
    )
    return pl.pallas_call(
        _make_head_kernel(num_classes),
        out_shape=jax.ShapeDtypeStruct((g_pad, c_pad), jnp.float32),
        grid_spec=grid_spec,
        compiler_params=pltpu.CompilerParams(
            dimension_semantics=("arbitrary",),
            vmem_limit_bytes=vmem_limit),
        cost_estimate=pl.CostEstimate(
            flops=2 * (g_pad * n_pad * h_pad + g_pad * h_pad * c_pad),
            transcendentals=g_pad * c_pad,
            bytes_accessed=(g_pad * n_pad * 2 + n_pad * h_pad * 2
                            + h_pad * c_pad * 2 + g_pad * c_pad * 4)),
    )(pool_bf16, h2_bf16, wf_bf16, bf_f32)


# ----------------------------------------------------------------------------
# JAX / host glue: graph operators, tile sparsity, padding, full forward
# ----------------------------------------------------------------------------
def build_norm_adjacency(edge_index, num_nodes, n_pad=None):
    """Dense symmetrically-normalized adjacency with self loops (PyG GCNConv norm)."""
    n_pad = num_nodes if n_pad is None else n_pad
    src, dst = edge_index[0], edge_index[1]
    a = jnp.zeros((n_pad, n_pad), jnp.float32)
    a = a.at[dst, src].add(1.0)                         # edge j -> i lands in row i
    idx = jnp.arange(num_nodes)
    a = a.at[idx, idx].add(1.0)                         # self loops on real nodes
    deg = jnp.sum(a, axis=1)
    dinv = jnp.where(deg > 0, jax.lax.rsqrt(deg), 0.0)
    return dinv[:, None] * a * dinv[None, :]


def build_pool_matrix(batch, num_graphs, num_nodes):
    """pool[g, n] = 1/count_g if batch[n] == g else 0 (global_mean_pool)."""
    onehot = (batch[None, :] == jnp.arange(num_graphs)[:, None]).astype(jnp.float32)
    counts = jnp.maximum(jnp.sum(onehot, axis=1, keepdims=True), 1.0)
    return onehot / counts


def _tile_structure(batch_np, num_graphs, n_pad, tile):
    """Compressed nonzero block-column lists derived O(N) from `batch` (host side).

    A tile (i, k) of the normalized adjacency can only be nonzero if some graph has
    nodes in both row-tile i and column-tile k (graphs never connect to each other)."""
    num_t = n_pad // tile
    bp = np.full((n_pad,), -1, np.int64)
    bp[:batch_np.shape[0]] = batch_np
    tiles = bp.reshape(num_t, tile)
    present = (tiles[:, :, None] == np.arange(num_graphs)[None, None, :]).any(axis=1)
    nz = (present.astype(np.int32) @ present.astype(np.int32).T) > 0
    nnz = nz.sum(axis=1).astype(np.int32)
    max_nnz = max(int(nnz.max()) if nnz.size else 1, 1)
    cols = np.zeros((num_t, max_nnz), np.int32)
    for i in range(num_t):
        idx = np.nonzero(nz[i])[0]
        if idx.size:
            cols[i, :idx.size] = idx
            cols[i, idx.size:] = idx[-1]   # repeat last valid id -> deduped (skipped) DMA
    return jnp.asarray(cols), jnp.asarray(nnz)


@functools.partial(jax.jit, static_argnames=("num_graphs", "tile"))
def _gcn_forward_jit(x, edge_index, batch, cols, nnz, params, *, num_graphs, tile):
    w1, b1, w2, b2, wf, bf = params
    n, f_in = x.shape
    hidden = w1.shape[1]
    out_dim = wf.shape[1]
    num_t = cols.shape[0]
    n_pad = num_t * tile
    f_pad = _round_up(f_in, 128)
    h_pad = _round_up(hidden, 128)
    c_pad = _round_up(out_dim, 128)
    g_pad = _round_up(num_graphs, 8)

    # Dense operators (built once, cast once to bf16 for the MXU).
    a_p = build_norm_adjacency(edge_index, n, n_pad).astype(jnp.bfloat16)
    pool = build_pool_matrix(batch, num_graphs, n)
    pool_p = _pad2(pool, g_pad, n_pad).astype(jnp.bfloat16)

    x_p = _pad2(x, n_pad, f_pad).astype(jnp.bfloat16)
    w1_p = _pad2(w1, f_pad, h_pad).astype(jnp.bfloat16)
    w2_p = _pad2(w2, h_pad, h_pad).astype(jnp.bfloat16)
    wf_p = _pad2(wf, h_pad, c_pad).astype(jnp.bfloat16)
    b1_p = _pad2(b1, 1, h_pad).astype(jnp.float32)
    b2_p = _pad2(b2, 1, h_pad).astype(jnp.float32)
    bf_p = _pad2(bf, 1, c_pad).astype(jnp.float32)

    # Layer 1: XW hoisted, then A @ XW with zero-tile DMA skipping.
    xw1 = xw_matmul(x_p, w1_p, tm=tile)
    h1 = gcn_a_layer(a_p, cols, nnz, xw1, b1_p, tm=tile, tk=tile)
    # Layer 2.
    xw2 = xw_matmul(h1, w2_p, tm=tile)
    h2 = gcn_a_layer(a_p, cols, nnz, xw2, b2_p, tm=tile, tk=tile)
    # Mean pool -> FC -> log_softmax.
    out_pad = gcn_head(pool_p, h2, wf_p, bf_p, out_dim, tk=tile)
    return out_pad[:num_graphs, :out_dim]


def gcn_forward(x, edge_index, batch, params, *, num_graphs):
    n = x.shape[0]
    # Bigger tiles for bigger graphs (DMA efficiency); keep num_i >= 2 once N allows
    # so both v7x TensorCores get row tiles.
    tile = 512 if n >= 1024 else (256 if n >= 512 else 128)
    n_pad = _round_up(n, tile)
    batch_np = np.asarray(jax.device_get(batch)).astype(np.int64)
    cols, nnz = _tile_structure(batch_np, num_graphs, n_pad, tile)
    return _gcn_forward_jit(x, edge_index, batch, cols, nnz, params,
                            num_graphs=num_graphs, tile=tile)


def init_params(key, input_dim, hidden_dim, output_dim):
    k = jax.random.split(key, 6)

    def glorot(rng, shape):
        lim = jnp.sqrt(6.0 / (shape[0] + shape[1]))
        return jax.random.uniform(rng, shape, jnp.float32, -lim, lim)

    w1 = glorot(k[0], (input_dim, hidden_dim))
    b1 = jnp.zeros((1, hidden_dim), jnp.float32)
    w2 = glorot(k[1], (hidden_dim, hidden_dim))
    b2 = jnp.zeros((1, hidden_dim), jnp.float32)
    wf = glorot(k[2], (hidden_dim, output_dim))
    bf = 0.01 * jax.random.normal(k[3], (1, output_dim), jnp.float32)
    return w1, b1, w2, b2, wf, bf


def reference_forward(x, a, pool, params):
    w1, b1, w2, b2, wf, bf = params
    h = jnp.maximum(a @ (x @ w1) + b1, 0.0)
    h = jnp.maximum(a @ (h @ w2) + b2, 0.0)
    p = pool @ h
    logits = p @ wf + bf
    return jax.nn.log_softmax(logits, axis=1)


if __name__ == "__main__":
    key = jax.random.PRNGKey(0)
    num_nodes, input_dim, hidden_dim, output_dim = 16, 8, 32, 4
    num_graphs = 2

    kx, kp = jax.random.split(key)
    x = jax.random.normal(kx, (num_nodes, input_dim), jnp.float32)

    # small undirected graph: ring within each graph of 8 nodes
    edges = []
    for g in range(num_graphs):
        base = g * 8
        for i in range(8):
            u, v = base + i, base + (i + 1) % 8
            edges.append((u, v))
            edges.append((v, u))
    edge_index = jnp.array(edges, jnp.int32).T                      # (2, E)
    batch = jnp.repeat(jnp.arange(num_graphs, dtype=jnp.int32), 8)  # (N,)

    params = init_params(kp, input_dim, hidden_dim, output_dim)

    out = gcn_forward(x, edge_index, batch, params, num_graphs=num_graphs)
    jax.block_until_ready(out)

    # sanity: shape, log_softmax rows exp-sum to 1, and agreement with f32 reference
    assert out.shape == (num_graphs, output_dim)
    assert bool(jnp.allclose(jnp.sum(jnp.exp(out), axis=1), 1.0, atol=1e-4))

    a_dense = build_norm_adjacency(edge_index, num_nodes)
    pool_dense = build_pool_matrix(batch, num_graphs, num_nodes)
    ref = reference_forward(x, a_dense, pool_dense, params)
    assert bool(jnp.allclose(out, ref, atol=5e-2)), (out, ref)

    print("KERNEL_OK")
</pallas_src>

<mosaic_0001>
module attributes {stable_mosaic.version = 11 : i64} {
  func.func private @main(%arg0: i32) attributes {dimension_semantics = [#tpu.dimension_semantics<core_parallel>], iteration_bounds = array<i64: 2>, tpu.core_type = #tpu.core_type<sc_scalar_subcore>, window_params = []} {
    return
  }
}

module attributes {stable_mosaic.version = 11 : i64} {
  func.func private @main(%arg0: i32) attributes {dimension_semantics = [#tpu.dimension_semantics<core_parallel>], iteration_bounds = array<i64: 2>, tpu.core_type = #tpu.core_type<sc_scalar_subcore>, window_params = []} {
    return
  }
}

module attributes {stable_mosaic.version = 11 : i64} {
  func.func @_xw_kernel(%arg0: i32, %arg1: memref<128x128xbf16, #tpu.memory_space<vmem>>, %arg2: memref<128x128xbf16, #tpu.memory_space<vmem>>, %arg3: memref<128x128xbf16, #tpu.memory_space<vmem>>) attributes {dimension_semantics = [#tpu.dimension_semantics<parallel>], iteration_bounds = array<i64: 1>, scalar_prefetch = 0 : i64, scratch_operands = 0 : i64, tpu.core_type = #tpu.core_type<tc>, window_params = [{transform_indices = @transform_0, window_bounds = array<i64: 128, 128>}, {pipeline_mode = #tpu.pipeline_mode<synchronous>, transform_indices = @transform_1, window_bounds = array<i64: 128, 128>}, {transform_indices = @transform_2, window_bounds = array<i64: 128, 128>}]} {
    %c0 = arith.constant 0 : index
    %c0_0 = arith.constant 0 : index
    %0 = vector.load %arg1[%c0, %c0_0] : memref<128x128xbf16, #tpu.memory_space<vmem>>, vector<128x128xbf16>
    %c0_1 = arith.constant 0 : index
    %c0_2 = arith.constant 0 : index
    %1 = vector.load %arg2[%c0_1, %c0_2] : memref<128x128xbf16, #tpu.memory_space<vmem>>, vector<128x128xbf16>
    %cst = arith.constant dense<0.000000e+00> : vector<128x128xf32>
    %2 = tpu.matmul %0, %1, %cst {dimension_numbers = #tpu.dot_dimension_numbers<[1], [0], [0], [1], [0, 0, 1, 1], [], []>} : vector<128x128xbf16>, vector<128x128xbf16>, vector<128x128xf32> -> vector<128x128xf32>
    %3 = arith.truncf %2 : vector<128x128xf32> to vector<128x128xbf16>
    %c0_3 = arith.constant 0 : index
    %c0_4 = arith.constant 0 : index
    %4 = vector.load %arg3[%c0_3, %c0_4] : memref<128x128xbf16, #tpu.memory_space<vmem>>, vector<128x128xbf16>
    tpu.vector_store %arg3[%c0_3, %c0_4], %3 {strides = array<i32>} : memref<128x128xbf16, #tpu.memory_space<vmem>>, vector<128x128xbf16>,
    return
  }
  func.func @transform_0(%arg0: i32) -> (i32, i32) {
    %c0_i32 = arith.constant 0 : i32
    %c0_i32_0 = arith.constant 0 : i32
    return %arg0, %c0_i32 : i32, i32
  }
  func.func @transform_1(%arg0: i32) -> (i32, i32) {
    %c0_i32 = arith.constant 0 : i32
    %c0_i32_0 = arith.constant 0 : i32
    %c0_i32_1 = arith.constant 0 : i32
    return %c0_i32, %c0_i32_0 : i32, i32
  }
  func.func @transform_2(%arg0: i32) -> (i32, i32) {
    %c0_i32 = arith.constant 0 : i32
    %c0_i32_0 = arith.constant 0 : i32
    return %arg0, %c0_i32 : i32, i32
  }
}

module attributes {stable_mosaic.version = 11 : i64} {
  func.func @kernel(%arg0: i32, %arg1: i32, %arg2: memref<1x1xi32, #tpu.memory_space<smem>>, %arg3: memref<1xi32, #tpu.memory_space<smem>>, %arg4: memref<128x128xbf16, #tpu.memory_space<vmem>>, %arg5: memref<128x128xbf16, #tpu.memory_space<vmem>>, %arg6: memref<1x128xf32, #tpu.memory_space<vmem>>, %arg7: memref<128x128xbf16, #tpu.memory_space<vmem>>, %arg8: memref<128x128xf32, #tpu.memory_space<vmem>>) attributes {dimension_semantics = [#tpu.dimension_semantics<parallel>, #tpu.dimension_semantics<arbitrary>], iteration_bounds = array<i64: 1, 1>, scalar_prefetch = 2 : i64, scratch_operands = 1 : i64, tpu.core_type = #tpu.core_type<tc>, window_params = [{transform_indices = @transform_0, window_bounds = array<i64: 128, 128>}, {pipeline_mode = #tpu.pipeline_mode<synchronous>, transform_indices = @transform_1, window_bounds = array<i64: 128, 128>}, {pipeline_mode = #tpu.pipeline_mode<synchronous>, transform_indices = @transform_2, window_bounds = array<i64: 1, 128>}, {transform_indices = @transform_3, window_bounds = array<i64: 128, 128>}]} {
    %c0_i32 = arith.constant 0 : i32
    %0 = arith.cmpi eq, %arg1, %c0_i32 : i32
    %1 = arith.extui %0 : i1 to i32
    %c0_i32_0 = arith.constant 0 : i32
    %2 = arith.cmpi ne, %1, %c0_i32_0 : i32
    scf.if %2 {
      %cst = arith.constant 0.000000e+00 : f32
      %11 = vector.broadcast %cst : f32 to vector<128x128xf32>
      %c0 = arith.constant 0 : index
      %c0_4 = arith.constant 0 : index
      %12 = vector.load %arg8[%c0, %c0_4] : memref<128x128xf32, #tpu.memory_space<vmem>>, vector<128x128xf32>
      tpu.vector_store %arg8[%c0, %c0_4], %11 {strides = array<i32>} : memref<128x128xf32, #tpu.memory_space<vmem>>, vector<128x128xf32>,
    } else {
    }
    %3 = arith.index_cast %arg0 : i32 to index
    %4 = memref.load %arg3[%3] : memref<1xi32, #tpu.memory_space<smem>>
    %5 = arith.cmpi slt, %arg1, %4 : i32
    %6 = arith.extui %5 : i1 to i32
    %c0_i32_1 = arith.constant 0 : i32
    %7 = arith.cmpi ne, %6, %c0_i32_1 : i32
    scf.if %7 {
      %11 = arith.index_cast %arg0 : i32 to index
      %12 = arith.index_cast %arg1 : i32 to index
      %13 = memref.load %arg2[%11, %12] : memref<1x1xi32, #tpu.memory_space<smem>>
      %c128_i32 = arith.constant 128 : i32
      %14 = arith.muli %13, %c128_i32 : i32
      %15 = tpu.assume_multiple %14, 128 : i32
      %16 = arith.index_cast %15 : i32 to index
      %c0 = arith.constant 0 : index
      %17 = vector.load %arg5[%16, %c0] : memref<128x128xbf16, #tpu.memory_space<vmem>>, vector<128x128xbf16>
      %c0_4 = arith.constant 0 : index
      %c0_5 = arith.constant 0 : index
      %18 = vector.load %arg8[%c0_4, %c0_5] : memref<128x128xf32, #tpu.memory_space<vmem>>, vector<128x128xf32>
      %c0_6 = arith.constant 0 : index
      %c0_7 = arith.constant 0 : index
      %19 = vector.load %arg4[%c0_6, %c0_7] : memref<128x128xbf16, #tpu.memory_space<vmem>>, vector<128x128xbf16>
      %cst = arith.constant dense<0.000000e+00> : vector<128x128xf32>
      %20 = tpu.matmul %19, %17, %cst {dimension_numbers = #tpu.dot_dimension_numbers<[1], [0], [0], [1], [0, 0, 1, 1], [], []>} : vector<128x128xbf16>, vector<128x128xbf16>, vector<128x128xf32> -> vector<128x128xf32>
      %21 = arith.addf %18, %20 : vector<128x128xf32>
      %c0_8 = arith.constant 0 : index
      %c0_9 = arith.constant 0 : index
      %22 = vector.load %arg8[%c0_8, %c0_9] : memref<128x128xf32, #tpu.memory_space<vmem>>, vector<128x128xf32>
      tpu.vector_store %arg8[%c0_8, %c0_9], %21 {strides = array<i32>} : memref<128x128xf32, #tpu.memory_space<vmem>>, vector<128x128xf32>,
    } else {
    }
    %c0_i32_2 = arith.constant 0 : i32
    %8 = arith.cmpi eq, %arg1, %c0_i32_2 : i32
    %9 = arith.extui %8 : i1 to i32
    %c0_i32_3 = arith.constant 0 : i32
    %10 = arith.cmpi ne, %9, %c0_i32_3 : i32
    scf.if %10 {
      %c0 = arith.constant 0 : index
      %c0_4 = arith.constant 0 : index
      %11 = vector.load %arg8[%c0, %c0_4] : memref<128x128xf32, #tpu.memory_space<vmem>>, vector<128x128xf32>
      %c0_5 = arith.constant 0 : index
      %c0_6 = arith.constant 0 : index
      %12 = vector.load %arg6[%c0_5, %c0_6] : memref<1x128xf32, #tpu.memory_space<vmem>>, vector<1x128xf32>
      %13 = vector.broadcast %12 : vector<1x128xf32> to vector<128x128xf32>
      %14 = arith.addf %11, %13 : vector<128x128xf32>
      %cst = arith.constant 0.000000e+00 : f32
      %15 = vector.broadcast %cst : f32 to vector<128x128xf32>
      %16 = arith.maximumf %14, %15 : vector<128x128xf32>
      %17 = arith.truncf %16 : vector<128x128xf32> to vector<128x128xbf16>
      %c0_7 = arith.constant 0 : index
      %c0_8 = arith.constant 0 : index
      %18 = vector.load %arg7[%c0_7, %c0_8] : memref<128x128xbf16, #tpu.memory_space<vmem>>, vector<128x128xbf16>
      tpu.vector_store %arg7[%c0_7, %c0_8], %17 {strides = array<i32>} : memref<128x128xbf16, #tpu.memory_space<vmem>>, vector<128x128xbf16>,
    } else {
    }
    return
  }
  func.func @transform_0(%arg0: i32, %arg1: i32, %arg2: memref<1x1xi32, #tpu.memory_space<smem>>, %arg3: memref<1xi32, #tpu.memory_space<smem>>) -> (i32, i32) {
    %0 = arith.index_cast %arg0 : i32 to index
    %1 = arith.index_cast %arg1 : i32 to index
    %2 = memref.load %arg2[%0, %1] : memref<1x1xi32, #tpu.memory_space<smem>>
    %c0_i32 = arith.constant 0 : i32
    return %arg0, %2 : i32, i32
  }
  func.func @transform_1(%arg0: i32, %arg1: i32, %arg2: memref<1x1xi32, #tpu.memory_space<smem>>, %arg3: memref<1xi32, #tpu.memory_space<smem>>) -> (i32, i32) {
    %c0_i32 = arith.constant 0 : i32
    %c0_i32_0 = arith.constant 0 : i32
    %c0_i32_1 = arith.constant 0 : i32
    return %c0_i32, %c0_i32_0 : i32, i32
  }
  func.func @transform_2(%arg0: i32, %arg1: i32, %arg2: memref<1x1xi32, #tpu.memory_space<smem>>, %arg3: memref<1xi32, #tpu.memory_space<smem>>) -> (i32, i32) {
    %c0_i32 = arith.constant 0 : i32
    %c0_i32_0 = arith.constant 0 : i32
    %c0_i32_1 = arith.constant 0 : i32
    return %c0_i32, %c0_i32_0 : i32, i32
  }
  func.func @transform_3(%arg0: i32, %arg1: i32, %arg2: memref<1x1xi32, #tpu.memory_space<smem>>, %arg3: memref<1xi32, #tpu.memory_space<smem>>) -> (i32, i32) {
    %c0_i32 = arith.constant 0 : i32
    %c0_i32_0 = arith.constant 0 : i32
    return %arg0, %c0_i32 : i32, i32
  }
}

module attributes {stable_mosaic.version = 11 : i64} {
  func.func @kernel(%arg0: i32, %arg1: memref<8x128xbf16, #tpu.memory_space<vmem>>, %arg2: memref<128x128xbf16, #tpu.memory_space<vmem>>, %arg3: memref<128x128xbf16, #tpu.memory_space<vmem>>, %arg4: memref<1x128xf32, #tpu.memory_space<vmem>>, %arg5: memref<8x128xf32, #tpu.memory_space<vmem>>, %arg6: memref<8x128xf32, #tpu.memory_space<vmem>>) attributes {dimension_semantics = [#tpu.dimension_semantics<arbitrary>], iteration_bounds = array<i64: 1>, scalar_prefetch = 0 : i64, scratch_operands = 1 : i64, tpu.core_type = #tpu.core_type<tc>, window_params = [{transform_indices = @transform_0, window_bounds = array<i64: 8, 128>}, {transform_indices = @transform_1, window_bounds = array<i64: 128, 128>}, {pipeline_mode = #tpu.pipeline_mode<synchronous>, transform_indices = @transform_2, window_bounds = array<i64: 128, 128>}, {pipeline_mode = #tpu.pipeline_mode<synchronous>, transform_indices = @transform_3, window_bounds = array<i64: 1, 128>}, {pipeline_mode = #tpu.pipeline_mode<synchronous>, transform_indices = @transform_4, window_bounds = array<i64: 8, 128>}]} {
    %c0_i32 = arith.constant 0 : i32
    %0 = arith.cmpi eq, %arg0, %c0_i32 : i32
    %1 = arith.extui %0 : i1 to i32
    %c0_i32_0 = arith.constant 0 : i32
    %2 = arith.cmpi ne, %1, %c0_i32_0 : i32
    scf.if %2 {
      %cst_10 = arith.constant 0.000000e+00 : f32
      %12 = vector.broadcast %cst_10 : f32 to vector<8x128xf32>
      %c0_11 = arith.constant 0 : index
      %c0_12 = arith.constant 0 : index
      %13 = vector.load %arg6[%c0_11, %c0_12] : memref<8x128xf32, #tpu.memory_space<vmem>>, vector<8x128xf32>
      tpu.vector_store %arg6[%c0_11, %c0_12], %12 {strides = array<i32>} : memref<8x128xf32, #tpu.memory_space<vmem>>, vector<8x128xf32>,
    } else {
    }
    %c0 = arith.constant 0 : index
    %c0_1 = arith.constant 0 : index
    %3 = vector.load %arg6[%c0, %c0_1] : memref<8x128xf32, #tpu.memory_space<vmem>>, vector<8x128xf32>
    %c0_2 = arith.constant 0 : index
    %c0_3 = arith.constant 0 : index
    %4 = vector.load %arg1[%c0_2, %c0_3] : memref<8x128xbf16, #tpu.memory_space<vmem>>, vector<8x128xbf16>
    %c0_4 = arith.constant 0 : index
    %c0_5 = arith.constant 0 : index
    %5 = vector.load %arg2[%c0_4, %c0_5] : memref<128x128xbf16, #tpu.memory_space<vmem>>, vector<128x128xbf16>
    %cst = arith.constant dense<0.000000e+00> : vector<8x128xf32>
    %6 = tpu.matmul %4, %5, %cst {dimension_numbers = #tpu.dot_dimension_numbers<[1], [0], [0], [1], [0, 0, 1, 1], [], []>} : vector<8x128xbf16>, vector<128x128xbf16>, vector<8x128xf32> -> vector<8x128xf32>
    %7 = arith.addf %3, %6 : vector<8x128xf32>
    %c0_6 = arith.constant 0 : index
    %c0_7 = arith.constant 0 : index
    %8 = vector.load %arg6[%c0_6, %c0_7] : memref<8x128xf32, #tpu.memory_space<vmem>>, vector<8x128xf32>
    tpu.vector_store %arg6[%c0_6, %c0_7], %7 {strides = array<i32>} : memref<8x128xf32, #tpu.memory_space<vmem>>, vector<8x128xf32>,
    %c0_i32_8 = arith.constant 0 : i32
    %9 = arith.cmpi eq, %arg0, %c0_i32_8 : i32
    %10 = arith.extui %9 : i1 to i32
    %c0_i32_9 = arith.constant 0 : i32
    %11 = arith.cmpi ne, %10, %c0_i32_9 : i32
    scf.if %11 {
      %c0_10 = arith.constant 0 : index
      %c0_11 = arith.constant 0 : index
      %12 = vector.load %arg6[%c0_10, %c0_11] : memref<8x128xf32, #tpu.memory_space<vmem>>, vector<8x128xf32>
      %13 = arith.truncf %12 : vector<8x128xf32> to vector<8x128xbf16>
      %c0_12 = arith.constant 0 : index
      %c0_13 = arith.constant 0 : index
      %14 = vector.load %arg3[%c0_12, %c0_13] : memref<128x128xbf16, #tpu.memory_space<vmem>>, vector<128x128xbf16>
      %cst_14 = arith.constant dense<0.000000e+00> : vector<8x128xf32>
      %15 = tpu.matmul %13, %14, %cst_14 {dimension_numbers = #tpu.dot_dimension_numbers<[1], [0], [0], [1], [0, 0, 1, 1], [], []>} : vector<8x128xbf16>, vector<128x128xbf16>, vector<8x128xf32> -> vector<8x128xf32>
      %c0_15 = arith.constant 0 : index
      %c0_16 = arith.constant 0 : index
      %16 = vector.load %arg4[%c0_15, %c0_16] : memref<1x128xf32, #tpu.memory_space<vmem>>, vector<1x128xf32>
      %17 = vector.broadcast %16 : vector<1x128xf32> to vector<8x128xf32>
      %18 = arith.addf %15, %17 : vector<8x128xf32>
      %19 = tpu.iota {dimensions = array<i32: 1>} : vector<8x128xi32>
      %c4_i32 = arith.constant 4 : i32
      %20 = vector.broadcast %c4_i32 : i32 to vector<8x128xi32>
      %21 = arith.cmpi slt, %19, %20 : vector<8x128xi32>
      %cst_17 = arith.constant -1.000000e+30 : f32
      %22 = vector.broadcast %cst_17 : f32 to vector<8x128xf32>
      %23 = arith.select %21, %18, %22 : vector<8x128xi1>, vector<8x128xf32>
      %cst_18 = arith.constant dense<0xFF800000> : vector<8xf32>
      %24 = vector.multi_reduction <maximumf>, %23, %cst_18 [1] : vector<8x128xf32> to vector<8xf32>
      %25 = vector.shape_cast %24 : vector<8xf32> to vector<8x1xf32>
      %26 = vector.broadcast %25 : vector<8x1xf32> to vector<8x128xf32>
      %27 = arith.subf %23, %26 : vector<8x128xf32>
      %28 = math.exp %27 : vector<8x128xf32>
      %cst_19 = arith.constant 0.000000e+00 : f32
      %29 = vector.broadcast %cst_19 : f32 to vector<8x128xf32>
      %30 = arith.select %21, %28, %29 : vector<8x128xi1>, vector<8x128xf32>
      %cst_20 = arith.constant dense<0.000000e+00> : vector<8xf32>
      %31 = vector.multi_reduction <add>, %30, %cst_20 [1] : vector<8x128xf32> to vector<8xf32>
      %32 = vector.shape_cast %31 : vector<8xf32> to vector<8x1xf32>
      %33 = math.log %32 : vector<8x1xf32>
      %34 = vector.broadcast %33 : vector<8x1xf32> to vector<8x128xf32>
      %35 = arith.subf %27, %34 : vector<8x128xf32>
      %c0_21 = arith.constant 0 : index
      %c0_22 = arith.constant 0 : index
      %36 = vector.load %arg5[%c0_21, %c0_22] : memref<8x128xf32, #tpu.memory_space<vmem>>, vector<8x128xf32>
      tpu.vector_store %arg5[%c0_21, %c0_22], %35 {strides = array<i32>} : memref<8x128xf32, #tpu.memory_space<vmem>>, vector<8x128xf32>,
    } else {
    }
    return
  }
  func.func @transform_0(%arg0: i32) -> (i32, i32) {
    %c0_i32 = arith.constant 0 : i32
    %c0_i32_0 = arith.constant 0 : i32
    return %c0_i32, %arg0 : i32, i32
  }
  func.func @transform_1(%arg0: i32) -> (i32, i32) {
    %c0_i32 = arith.constant 0 : i32
    %c0_i32_0 = arith.constant 0 : i32
    return %arg0, %c0_i32 : i32, i32
  }
  func.func @transform_2(%arg0: i32) -> (i32, i32) {
    %c0_i32 = arith.constant 0 : i32
    %c0_i32_0 = arith.constant 0 : i32
    %c0_i32_1 = arith.constant 0 : i32
    return %c0_i32, %c0_i32_0 : i32, i32
  }
  func.func @transform_3(%arg0: i32) -> (i32, i32) {
    %c0_i32 = arith.constant 0 : i32
    %c0_i32_0 = arith.constant 0 : i32
    %c0_i32_1 = arith.constant 0 : i32
    return %c0_i32, %c0_i32_0 : i32, i32
  }
  func.func @transform_4(%arg0: i32) -> (i32, i32) {
    %c0_i32 = arith.constant 0 : i32
    %c0_i32_0 = arith.constant 0 : i32
    %c0_i32_1 = arith.constant 0 : i32
    return %c0_i32, %c0_i32_0 : i32, i32
  }
}

</mosaic_0001>

<bundles_post_ra>
// kernel: _gcn_forward_jit.5
= control target key start
LH: loop header
LB: loop body
LE: loop exit
PB: predicated region body
PF: predicated region fallthrough
CT: control target
= control target key end

     0   :  { %s583_s1 = inlined_call_operand.vmem [shape: bf16[128,128], index: 1, kind: input, shape index: {}]   ;;  %s584_s0 = inlined_call_operand.vmem [shape: bf16[128,128], index: 0, kind: input, shape index: {}]   ;;  %s585_s2 = inlined_call_operand.vmem [shape: bf16[128,128], index: 2, kind: output, shape index: {}]  }
   0x1   :  { %v480_v0 = vld [vmem:[%s583_s1 + $0x38] sm:$0xff]   ;;  %v481_v1 = vld [vmem:[%s583_s1 + $0x30] sm:$0xff]   ;;  %v482_v2 = vld [vmem:[%s583_s1 + $0x28] sm:$0xff]  }
   0x2   :  { %432 = vmatprep.subr.bf16.mxu0 %v480_v0  ;;  %464 = vmatprep.subr.bf16.mxu1 %v480_v0  ;;  %v483_v3 = vld [vmem:[%s583_s1 + $0x20] sm:$0xff]   ;;  %v484_v6 = vld [vmem:[%s583_s1 + $0x18] sm:$0xff]   ;;  %v485_v7 = vld [vmem:[%s583_s1 + $0x10] sm:$0xff]  }
   0x3   :  { %433 = vmatpush3.bf16.msra.mxu0 %v480_v0  ;;  %472 = vmatpush3.bf16.msra.mxu1 %v480_v0  ;;  %v488_v4 = vld [vmem:[%s584_s0] sm:$0xff]   ;;  %v486_v8 = vld [vmem:[%s583_s1 + $0x8] sm:$0xff]   ;;  %v492_v12 = vld [vmem:[%s584_s0 + $0x10] sm:$0xff]  }
   0x4   :  { %434 = vmatprep.subr.bf16.mxu0 %v481_v1  ;;  %465 = vmatprep.subr.bf16.mxu1 %v481_v1  ;;  %v489_v5 = vld [vmem:[%s584_s0 + $0x20] sm:$0xff]   ;;  %v490_v10 = vld [vmem:[%s584_s0 + $0x8] sm:$0xff]   ;;  %v493_v13 = vld [vmem:[%s584_s0 + $0x30] sm:$0xff]  }
   0x5   :  { %448 = vmatprep.mubr.bf16.mxu0 %v488_v4  ;;  %456 = vmatprep.mubr.bf16.mxu1 %v489_v5  ;;  %v487_v9 = vld [vmem:[%s583_s1] sm:$0xff]   ;;  %v491_v11 = vld [vmem:[%s584_s0 + $0x28] sm:$0xff]   ;;  %v494_v14 = vld [vmem:[%s584_s0 + $0x18] sm:$0xff]  }
   0x6   :  { %v495_v15 = vld [vmem:[%s584_s0 + $0x38] sm:$0xff]  }
   0x7   :  { %435 = vmatpush3.bf16.msra.mxu0 %v481_v1  ;;  %473 = vmatpush3.bf16.msra.mxu1 %v481_v1 }
   0x8   :  { %436 = vmatprep.subr.bf16.mxu0 %v482_v2  ;;  %466 = vmatprep.subr.bf16.mxu1 %v482_v2 }
   0xb   :  { %437 = vmatpush3.bf16.msra.mxu0 %v482_v2  ;;  %474 = vmatpush3.bf16.msra.mxu1 %v482_v2 }
   0xc   :  { %438 = vmatprep.subr.bf16.mxu0 %v483_v3  ;;  %467 = vmatprep.subr.bf16.mxu1 %v483_v3 }
   0xf   :  { %439 = vmatpush3.bf16.msra.mxu0 %v483_v3  ;;  %475 = vmatpush3.bf16.msra.mxu1 %v483_v3 }
  0x10   :  { %440 = vmatprep.subr.bf16.mxu0 %v484_v6  ;;  %468 = vmatprep.subr.bf16.mxu1 %v484_v6 }
  0x13   :  { %441 = vmatpush3.bf16.msra.mxu0 %v484_v6  ;;  %476 = vmatpush3.bf16.msra.mxu1 %v484_v6 }
  0x14   :  { %442 = vmatprep.subr.bf16.mxu0 %v485_v7  ;;  %469 = vmatprep.subr.bf16.mxu1 %v485_v7 }
  0x17   :  { %443 = vmatpush3.bf16.msra.mxu0 %v485_v7  ;;  %477 = vmatpush3.bf16.msra.mxu1 %v485_v7 }
  0x18   :  { %444 = vmatprep.subr.bf16.mxu0 %v486_v8  ;;  %470 = vmatprep.subr.bf16.mxu1 %v486_v8 }
  0x1b   :  { %445 = vmatpush3.bf16.msra.mxu0 %v486_v8  ;;  %478 = vmatpush3.bf16.msra.mxu1 %v486_v8 }
  0x1c   :  { %446 = vmatprep.subr.bf16.mxu0 %v487_v9  ;;  %471 = vmatprep.subr.bf16.mxu1 %v487_v9 }
  0x1f   :  { %447 = vmatpush3.bf16.msra.mxu0 %v487_v9  ;;  %479 = vmatpush3.bf16.msra.mxu1 %v487_v9 }
  0x22   :  { %449 = vmatmul.mubr.bf16.vlgmr.msra.gmra.mxu0 %v490_v10  ;;  %457 = vmatmul.mubr.bf16.vlgmr.msra.gmra.mxu1 %v491_v11 }
  0x23   :  { %452 = vmatprep.mubr.bf16.mxu0 %v492_v12  ;;  %460 = vmatprep.mubr.bf16.mxu1 %v493_v13 }
  0x2a   :  { %453 = vmatmul.mubr.bf16.gmra.mxu0 %v494_v14  ;;  %461 = vmatmul.mubr.bf16.gmra.mxu1 %v495_v15 }
  0xe2   :  { %v450_v16 = vpop.f32.mrf.mxu0  ;;  %v458_v17 = vpop.f32.mrf.mxu1 }
  0xe4   :  { %v174_v18 = vpop.f32.mrf.mxu0  ;;  %v206_v19 = vpop.f32.mrf.mxu1 }
  0xe6   :  { %v451_v20 = vpop.f32.mrf.mxu0  ;;  %v459_v21 = vpop.f32.mrf.mxu1 }
  0xe7   :  { %v377_v22 = vpack.c.bf16 %v451_v20, %v450_v16  ;;  %v397_v23 = vpack.c.bf16 %v459_v21, %v458_v17 }
  0xe8   :  { %v177_v24 = vpop.f32.mrf.mxu0  ;;  %v209_v25 = vpop.f32.mrf.mxu1 }
  0xe9   :  { %409 = vst [vmem:[%s585_s2 + $0x8] sm:$0xff] %v377_v22   ;;  %413 = vst [vmem:[%s585_s2 + $0x28] sm:$0xff] %v397_v23   ;;  %v372_v26 = vpack.c.bf16 %v177_v24, %v174_v18  ;;  %v392_v27 = vpack.c.bf16 %v209_v25, %v206_v19 }
  0xea   :  { %v454_v28 = vpop.f32.mrf.mxu0  ;;  %v462_v29 = vpop.f32.mrf.mxu1 }
  0xeb   :  { %373 = vst [vmem:[%s585_s2] sm:$0xff] %v372_v26   ;;  %412 = vst [vmem:[%s585_s2 + $0x20] sm:$0xff] %v392_v27  }
  0xec   :  { %v190_v30 = vpop.f32.mrf.mxu0  ;;  %v222_v31 = vpop.f32.mrf.mxu1 }
  0xee   :  { %v455_v32 = vpop.f32.mrf.mxu0  ;;  %v463_v33 = vpop.f32.mrf.mxu1 }
  0xef   :  { %v387_v34 = vpack.c.bf16 %v455_v32, %v454_v28  ;;  %v407_v35 = vpack.c.bf16 %v463_v33, %v462_v29 }
  0xf0   :  { %v193_v36 = vpop.f32.mrf.mxu0  ;;  %v225_v37 = vpop.f32.mrf.mxu1 }
  0xf1   :  { %411 = vst [vmem:[%s585_s2 + $0x18] sm:$0xff] %v387_v34   ;;  %415 = vst [vmem:[%s585_s2 + $0x38] sm:$0xff] %v407_v35   ;;  %v382_v38 = vpack.c.bf16 %v193_v36, %v190_v30  ;;  %v402_v39 = vpack.c.bf16 %v225_v37, %v222_v31 }
  0xf3   :  { %410 = vst [vmem:[%s585_s2 + $0x10] sm:$0xff] %v382_v38   ;;  %414 = vst [vmem:[%s585_s2 + $0x30] sm:$0xff] %v402_v39  }

// kernel: _gcn_forward_jit.6
= control target key start
LH: loop header
LB: loop body
LE: loop exit
PB: predicated region body
PF: predicated region fallthrough
CT: control target
= control target key end

     0   :  { %v690_v0 = vmov 0.0   ;;  %s790_s0 = inlined_call_operand.<no memory space> [shape: s32[1,1], index: 0, kind: input, shape index: {}]   ;;  %s791_s1 = inlined_call_operand.<no memory space> [shape: s32[1], index: 1, kind: input, shape index: {}]   ;;  %s792_s3 = inlined_call_operand.vmem [shape: bf16[128,128], index: 3, kind: input, shape index: {}]   ;;  %s793_s4 = inlined_call_operand.vmem [shape: f32[1,128], index: 4, kind: input, shape index: {}]   ;;  %s794_s5 = inlined_call_operand.vmem [shape: bf16[128,128], index: 5, kind: output, shape index: {}]   ;;  %s795_s2 = inlined_call_operand.vmem [shape: bf16[128,128], index: 2, kind: input, shape index: {}]  }
   0x1   :  { %10 = sst [smem:[#allocation4]] %s790_s0  ;;  %p42_p0 = scmp.lt.s32.totalorder %s790_s0, 0  ;;  %55 = vst [vmem:[#allocation2 + $0x30] sm:$0xff] %v690_v0  ;;  %56 = vst [vmem:[#allocation2] sm:$0xff] %v690_v0 }
   0x2   :  { %57 = vst [vmem:[#allocation2 + $0x58] sm:$0xff] %v690_v0  ;;  %58 = vst [vmem:[#allocation2 + $0x18] sm:$0xff] %v690_v0  ;;  %p510_p1 = scmp.le.s32.totalorder %s791_s1, 0 }
   0x3   :  { %59 = vst [vmem:[#allocation2 + $0x50] sm:$0xff] %v690_v0  ;;  %60 = vst [vmem:[#allocation2 + $0x68] sm:$0xff] %v690_v0  ;;  %s797_s0 = smov (!%p42_p0, %s790_s0), 0  ;;  %s79_s7 = sld [smem:[#allocation4]] (!%p510_p1) }
   0x4   :  { %61 = vst [vmem:[#allocation2 + $0x8] sm:$0xff] %v690_v0  ;;  %62 = vst [vmem:[#allocation2 + $0x48] sm:$0xff] %v690_v0  ;;  %s508_s26 = sshll.u32 %s797_s0, 2  ;;  %75 = sbr.rel (%p510_p1) target bundleno = 256 (0x100), region = 21 }
   0x5   :  { %63 = vst [vmem:[#allocation2 + $0x40] sm:$0xff] %v690_v0  ;;  %64 = vst [vmem:[#allocation2 + $0x20] sm:$0xff] %v690_v0  ;;  %s737_s29 = scalar_lea.vmem %s795_s2, %s508_s26 }
   0x6   :  { %65 = vst [vmem:[#allocation2 + $0x10] sm:$0xff] %v690_v0  ;;  %66 = vst [vmem:[#allocation2 + $0x38] sm:$0xff] %v690_v0 }
   0x7   :  { %67 = vst [vmem:[#allocation2 + $0x60] sm:$0xff] %v690_v0  ;;  %68 = vst [vmem:[#allocation2 + $0x70] sm:$0xff] %v690_v0 }
   0x8   :  { %69 = vst [vmem:[#allocation2 + $0x78] sm:$0xff] %v690_v0  ;;  %70 = vst [vmem:[#allocation2 + $0x28] sm:$0xff] %v690_v0 }
   0x9   :  { %v682_v1 = vld [vmem:[%s737_s29] sm:$0xff]   ;;  %s511_s8 = sshll.u32 %s79_s7, 7  ;;  %v684_v11 = vld [vmem:[%s737_s29 + $0x8] sm:$0xff]   ;;  %v686_v13 = vld [vmem:[%s737_s29 + $0x10] sm:$0xff]  }
   0xa   :  { %v683_v2 = vld [vmem:[%s737_s29 + $0x20] sm:$0xff]   ;;  %641 = vmatprep.mubr.bf16.mxu0 %v682_v1  ;;  %s81_s9 = sshra.s32 %s511_s8, 3  ;;  %v685_v12 = vld [vmem:[%s737_s29 + $0x28] sm:$0xff]   ;;  %v687_v14 = vld [vmem:[%s737_s29 + $0x30] sm:$0xff]  }
   0xb   :  { %649 = vmatprep.mubr.bf16.mxu1 %v683_v2  ;;  %s512_s0 = sshll.u32 %s81_s9, 2  ;;  %v688_v15 = vld [vmem:[%s737_s29 + $0x18] sm:$0xff]   ;;  %v101_v21 = vld [vmem:[#allocation2 + $0x30] sm:$0xff]  ;;  %v102_v33 = vld [vmem:[#allocation2] sm:$0xff] }
   0xc   :  { %s747_s2 = scalar_lea.vmem %s792_s3, %s512_s0  ;;  %v689_v16 = vld [vmem:[%s737_s29 + $0x38] sm:$0xff]   ;;  %v109_v22 = vld [vmem:[#allocation2 + $0x40] sm:$0xff]  ;;  %v107_v39 = vld [vmem:[#allocation2 + $0x8] sm:$0xff] }
   0xd   :  { %v674_v3 = vld [vmem:[%s747_s2 + $0x38] sm:$0xff]   ;;  %v675_v4 = vld [vmem:[%s747_s2 + $0x30] sm:$0xff]   ;;  %v676_v5 = vld [vmem:[%s747_s2 + $0x28] sm:$0xff]  }
   0xe   :  { %625 = vmatprep.subr.bf16.mxu0 %v674_v3  ;;  %657 = vmatprep.subr.bf16.mxu1 %v674_v3  ;;  %v677_v6 = vld [vmem:[%s747_s2 + $0x20] sm:$0xff]   ;;  %v678_v7 = vld [vmem:[%s747_s2 + $0x18] sm:$0xff]   ;;  %v679_v8 = vld [vmem:[%s747_s2 + $0x10] sm:$0xff]  }
   0xf   :  { %626 = vmatpush3.bf16.msra.mxu0 %v674_v3  ;;  %665 = vmatpush3.bf16.msra.mxu1 %v674_v3  ;;  %v680_v9 = vld [vmem:[%s747_s2 + $0x8] sm:$0xff]   ;;  %v681_v10 = vld [vmem:[%s747_s2] sm:$0xff]   ;;  %v103_v17 = vld [vmem:[#allocation2 + $0x58] sm:$0xff] }
  0x10   :  { %627 = vmatprep.subr.bf16.mxu0 %v675_v4  ;;  %658 = vmatprep.subr.bf16.mxu1 %v675_v4  ;;  %v111_v18 = vld [vmem:[#allocation2 + $0x10] sm:$0xff]  ;;  %v104_v27 = vld [vmem:[#allocation2 + $0x18] sm:$0xff]  ;;  %v110_v34 = vld [vmem:[#allocation2 + $0x20] sm:$0xff] }
  0x11   :  { %v112_v28 = vld [vmem:[#allocation2 + $0x38] sm:$0xff]  ;;  %v105_v45 = vld [vmem:[#allocation2 + $0x50] sm:$0xff]  ;;  %v113_v46 = vld [vmem:[#allocation2 + $0x60] sm:$0xff] }
  0x12   :  { %v115_v40 = vld [vmem:[#allocation2 + $0x78] sm:$0xff]  ;;  %v108_v51 = vld [vmem:[#allocation2 + $0x48] sm:$0xff]  ;;  %v114_v58 = vld [vmem:[#allocation2 + $0x70] sm:$0xff] }
  0x13   :  { %628 = vmatpush3.bf16.msra.mxu0 %v675_v4  ;;  %666 = vmatpush3.bf16.msra.mxu1 %v675_v4  ;;  %v116_v52 = vld [vmem:[#allocation2 + $0x28] sm:$0xff] }
  0x14   :  { %629 = vmatprep.subr.bf16.mxu0 %v676_v5  ;;  %659 = vmatprep.subr.bf16.mxu1 %v676_v5  ;;  %v106_v57 = vld [vmem:[#allocation2 + $0x68] sm:$0xff] }
  0x17   :  { %630 = vmatpush3.bf16.msra.mxu0 %v676_v5  ;;  %667 = vmatpush3.bf16.msra.mxu1 %v676_v5 }
  0x18   :  { %631 = vmatprep.subr.bf16.mxu0 %v677_v6  ;;  %660 = vmatprep.subr.bf16.mxu1 %v677_v6 }
  0x1b   :  { %632 = vmatpush3.bf16.msra.mxu0 %v677_v6  ;;  %668 = vmatpush3.bf16.msra.mxu1 %v677_v6 }
  0x1c   :  { %633 = vmatprep.subr.bf16.mxu0 %v678_v7  ;;  %661 = vmatprep.subr.bf16.mxu1 %v678_v7 }
  0x1f   :  { %634 = vmatpush3.bf16.msra.mxu0 %v678_v7  ;;  %669 = vmatpush3.bf16.msra.mxu1 %v678_v7 }
  0x20   :  { %635 = vmatprep.subr.bf16.mxu0 %v679_v8  ;;  %662 = vmatprep.subr.bf16.mxu1 %v679_v8 }
  0x23   :  { %636 = vmatpush3.bf16.msra.mxu0 %v679_v8  ;;  %670 = vmatpush3.bf16.msra.mxu1 %v679_v8 }
  0x24   :  { %637 = vmatprep.subr.bf16.mxu0 %v680_v9  ;;  %663 = vmatprep.subr.bf16.mxu1 %v680_v9 }
  0x27   :  { %638 = vmatpush3.bf16.msra.mxu0 %v680_v9  ;;  %671 = vmatpush3.bf16.msra.mxu1 %v680_v9 }
  0x28   :  { %639 = vmatprep.subr.bf16.mxu0 %v681_v10  ;;  %664 = vmatprep.subr.bf16.mxu1 %v681_v10 }
  0x2b   :  { %640 = vmatpush3.bf16.msra.mxu0 %v681_v10  ;;  %672 = vmatpush3.bf16.msra.mxu1 %v681_v10 }
  0x2e   :  { %642 = vmatmul.mubr.bf16.vlgmr.msra.gmra.mxu0 %v684_v11  ;;  %650 = vmatmul.mubr.bf16.vlgmr.msra.gmra.mxu1 %v685_v12 }
  0x2f   :  { %645 = vmatprep.mubr.bf16.mxu0 %v686_v13  ;;  %653 = vmatprep.mubr.bf16.mxu1 %v687_v14 }
  0x36   :  { %646 = vmatmul.mubr.bf16.gmra.mxu0 %v688_v15  ;;  %654 = vmatmul.mubr.bf16.gmra.mxu1 %v689_v16 }
  0xee   :  { %v643_v19 = vpop.f32.mrf.mxu0  ;;  %v651_v20 = vpop.f32.mrf.mxu1 }
  0xef   :  { %v328_v23 = vadd.f32 %v643_v19, %v103_v17  ;;  %v336_v24 = vadd.f32 %v651_v20, %v111_v18 }
  0xf0   :  { %v263_v25 = vpop.f32.mrf.mxu0  ;;  %v295_v26 = vpop.f32.mrf.mxu1 }
  0xf1   :  { %344 = vst [vmem:[#allocation2 + $0x58] sm:$0xff] %v328_v23  ;;  %352 = vst [vmem:[#allocation2 + $0x10] sm:$0xff] %v336_v24  ;;  %v326_v29 = vadd.f32 %v263_v25, %v101_v21  ;;  %v334_v30 = vadd.f32 %v295_v26, %v109_v22 }
  0xf2   :  { %v644_v31 = vpop.f32.mrf.mxu0  ;;  %v652_v32 = vpop.f32.mrf.mxu1 }
  0xf3   :  { %342 = vst [vmem:[#allocation2 + $0x30] sm:$0xff] %v326_v29  ;;  %350 = vst [vmem:[#allocation2 + $0x40] sm:$0xff] %v334_v30  ;;  %v329_v35 = vadd.f32 %v644_v31, %v104_v27  ;;  %v337_v36 = vadd.f32 %v652_v32, %v112_v28 }
  0xf4   :  { %v266_v37 = vpop.f32.mrf.mxu0  ;;  %v298_v38 = vpop.f32.mrf.mxu1 }
  0xf5   :  { %345 = vst [vmem:[#allocation2 + $0x18] sm:$0xff] %v329_v35  ;;  %353 = vst [vmem:[#allocation2 + $0x38] sm:$0xff] %v337_v36  ;;  %v327_v41 = vadd.f32 %v266_v37, %v102_v33  ;;  %v335_v42 = vadd.f32 %v298_v38, %v110_v34 }
  0xf6   :  { %v647_v43 = vpop.f32.mrf.mxu0  ;;  %v655_v44 = vpop.f32.mrf.mxu1 }
  0xf7   :  { %343 = vst [vmem:[#allocation2] sm:$0xff] %v327_v41  ;;  %351 = vst [vmem:[#allocation2 + $0x20] sm:$0xff] %v335_v42  ;;  %v332_v47 = vadd.f32 %v647_v43, %v107_v39  ;;  %v340_v48 = vadd.f32 %v655_v44, %v115_v40 }
  0xf8   :  { %v279_v49 = vpop.f32.mrf.mxu0  ;;  %v311_v50 = vpop.f32.mrf.mxu1 }
  0xf9   :  { %348 = vst [vmem:[#allocation2 + $0x8] sm:$0xff] %v332_v47  ;;  %356 = vst [vmem:[#allocation2 + $0x78] sm:$0xff] %v340_v48  ;;  %v330_v53 = vadd.f32 %v279_v49, %v105_v45  ;;  %v338_v54 = vadd.f32 %v311_v50, %v113_v46 }
  0xfa   :  { %v648_v55 = vpop.f32.mrf.mxu0  ;;  %v656_v56 = vpop.f32.mrf.mxu1 }
  0xfb   :  { %346 = vst [vmem:[#allocation2 + $0x50] sm:$0xff] %v330_v53  ;;  %354 = vst [vmem:[#allocation2 + $0x60] sm:$0xff] %v338_v54  ;;  %v333_v59 = vadd.f32 %v648_v55, %v108_v51  ;;  %v341_v60 = vadd.f32 %v656_v56, %v116_v52 }
  0xfc   :  { %v282_v61 = vpop.f32.mrf.mxu0  ;;  %v314_v62 = vpop.f32.mrf.mxu1 }
  0xfd   :  { %349 = vst [vmem:[#allocation2 + $0x48] sm:$0xff] %v333_v59  ;;  %357 = vst [vmem:[#allocation2 + $0x28] sm:$0xff] %v341_v60  ;;  %v331_v63 = vadd.f32 %v282_v61, %v106_v57  ;;  %v339_v0 = vadd.f32 %v314_v62, %v114_v58 }
  0xff   :  { %347 = vst [vmem:[#allocation2 + $0x68] sm:$0xff] %v331_v63  ;;  %355 = vst [vmem:[#allocation2 + $0x70] sm:$0xff] %v339_v0 }
 0x100 PF:  { %v361_v1 = vld [vmem:[#allocation2 + $0x30] sm:$0xff]  ;;  %v362_v2 = vld [vmem:[#allocation2] sm:$0xff]  ;;  %v363_v6 = vld [vmem:[#allocation2 + $0x58] sm:$0xff] }
 0x101   :  { %v529_v3 = vld [vmem:[%s793_s4] ss:$0 sm:$0xff]  ;;  %v364_v7 = vld [vmem:[#allocation2 + $0x18] sm:$0xff] }
 0x102   :  { %v384_v4 = vadd.f32 %v529_v3, %v361_v1  ;;  %v385_v5 = vadd.f32 %v529_v3, %v362_v2  ;;  %v365_v8 = vld [vmem:[#allocation2 + $0x50] sm:$0xff]  ;;  %v386_v9 = vadd.f32 %v529_v3, %v363_v6  ;;  %v387_v10 = vadd.f32 %v529_v3, %v364_v7  ;;  %v367_v13 = vld [vmem:[#allocation2 + $0x8] sm:$0xff] }
 0x103   :  { %v388_v12 = vadd.f32 %v529_v3, %v365_v8  ;;  %v390_v18 = vadd.f32 %v529_v3, %v367_v13  ;;  %v369_v19 = vld [vmem:[#allocation2 + $0x40] sm:$0xff] }
 0x104   :  { %v368_v14 = vld [vmem:[#allocation2 + $0x48] sm:$0xff]  ;;  %v400_v15 = vmax.f32 %v384_v4, 0.0  ;;  %v401_v16 = vmax.f32 %v385_v5, 0.0  ;;  %v370_v20 = vld [vmem:[#allocation2 + $0x20] sm:$0xff]  ;;  %v371_v21 = vld [vmem:[#allocation2 + $0x10] sm:$0xff]  ;;  %v402_v22 = vmax.f32 %v386_v9, 0.0  ;;  %v392_v31 = vadd.f32 %v529_v3, %v369_v19 }
 0x105   :  { %v403_v23 = vmax.f32 %v387_v10, 0.0  ;;  %v404_v24 = vmax.f32 %v388_v12, 0.0  ;;  %v391_v25 = vadd.f32 %v529_v3, %v368_v14  ;;  %v372_v26 = vld [vmem:[#allocation2 + $0x38] sm:$0xff]  ;;  %v373_v27 = vld [vmem:[#allocation2 + $0x60] sm:$0xff]  ;;  %v406_v30 = vmax.f32 %v390_v18, 0.0 }
 0x106   :  { %v366_v11 = vld [vmem:[#allocation2 + $0x68] sm:$0xff]  ;;  %v565_v28 = vpack.c.bf16 %v401_v16, %v400_v15  ;;  %v374_v32 = vld [vmem:[#allocation2 + $0x70] sm:$0xff]  ;;  %v393_v35 = vadd.f32 %v529_v3, %v370_v20  ;;  %v394_v36 = vadd.f32 %v529_v3, %v371_v21  ;;  %v375_v37 = vld [vmem:[#allocation2 + $0x78] sm:$0xff]  ;;  %v408_v40 = vmax.f32 %v392_v31, 0.0 }
 0x107   :  { %v389_v17 = vadd.f32 %v529_v3, %v366_v11  ;;  %v570_v33 = vpack.c.bf16 %v403_v23, %v402_v22  ;;  %v407_v34 = vmax.f32 %v391_v25, 0.0  ;;  %v376_v38 = vld [vmem:[#allocation2 + $0x28] sm:$0xff]  ;;  %v395_v41 = vadd.f32 %v529_v3, %v372_v26 }
 0x108   :  { %566 = vst [vmem:[%s794_s5] sm:$0xff] %v565_v28   ;;  %v396_v42 = vadd.f32 %v529_v3, %v373_v27  ;;  %v409_v44 = vmax.f32 %v393_v35, 0.0  ;;  %v410_v45 = vmax.f32 %v394_v36, 0.0  ;;  %v397_v46 = vadd.f32 %v529_v3, %v374_v32 }
 0x109   :  { %v405_v29 = vmax.f32 %v389_v17, 0.0  ;;  %602 = vst [vmem:[%s794_s5 + $0x8] sm:$0xff] %v570_v33   ;;  %v580_v43 = vpack.c.bf16 %v407_v34, %v406_v30  ;;  %v411_v47 = vmax.f32 %v395_v41, 0.0  ;;  %v398_v49 = vadd.f32 %v529_v3, %v375_v37 }
 0x10a   :  { %v412_v48 = vmax.f32 %v396_v42, 0.0  ;;  %v399_v50 = vadd.f32 %v529_v3, %v376_v38  ;;  %v585_v51 = vpack.c.bf16 %v409_v44, %v408_v40  ;;  %v413_v52 = vmax.f32 %v397_v46, 0.0 }
 0x10b   :  { %v575_v39 = vpack.c.bf16 %v405_v29, %v404_v24  ;;  %604 = vst [vmem:[%s794_s5 + $0x18] sm:$0xff] %v580_v43   ;;  %v590_v53 = vpack.c.bf16 %v411_v47, %v410_v45  ;;  %v414_v54 = vmax.f32 %v398_v49, 0.0 }
 0x10c   :  { %v415_v55 = vmax.f32 %v399_v50, 0.0  ;;  %605 = vst [vmem:[%s794_s5 + $0x20] sm:$0xff] %v585_v51   ;;  %v595_v56 = vpack.c.bf16 %v413_v52, %v412_v48 }
 0x10d   :  { %603 = vst [vmem:[%s794_s5 + $0x10] sm:$0xff] %v575_v39   ;;  %606 = vst [vmem:[%s794_s5 + $0x28] sm:$0xff] %v590_v53  }
 0x10e   :  { %v600_v57 = vpack.c.bf16 %v415_v55, %v414_v54  ;;  %607 = vst [vmem:[%s794_s5 + $0x30] sm:$0xff] %v595_v56  }
 0x110   :  { %608 = vst [vmem:[%s794_s5 + $0x38] sm:$0xff] %v600_v57  }

// kernel: _gcn_forward_jit.9
= control target key start
LH: loop header
LB: loop body
LE: loop exit
PB: predicated region body
PF: predicated region fallthrough
CT: control target
= control target key end

     0   :  { %v364_v0 = vmov 0.0   ;;  %vm365_vm0 = vmmov 0   ;;  %v247_v23 = vlaneseq  ;;  %s448_s1 = inlined_call_operand.vmem [shape: bf16[128,128], index: 1, kind: input, shape index: {}]   ;;  %s449_s2 = inlined_call_operand.vmem [shape: bf16[128,128], index: 2, kind: input, shape index: {}]   ;;  %s450_s0 = inlined_call_operand.vmem [shape: bf16[8,128], index: 0, kind: input, shape index: {}]   ;;  %s451_s3 = inlined_call_operand.vmem [shape: f32[1,128], index: 3, kind: input, shape index: {}]   ;;  %s452_s4 = inlined_call_operand.vmem [shape: f32[8,128], index: 4, kind: output, shape index: {}]  }
   0x1   :  { %302 = vmatprep.subr.bf16.mxu0 %v364_v0  ;;  %v344_v1 = vld [vmem:[%s448_s1 + $0x38] sm:$0xff]   ;;  %318 = vmatprep.mubr.msk.bf16.mxu0 %vm365_vm0, %v364_v0  ;;  %v345_v2 = vld [vmem:[%s448_s1 + $0x30] sm:$0xff]   ;;  %v346_v3 = vld [vmem:[%s448_s1 + $0x28] sm:$0xff]  }
   0x2   :  { %322 = vmatprep.subr.bf16.mxu1 %v364_v0  ;;  %338 = vmatprep.mubr.msk.bf16.mxu1 %vm365_vm0, %v364_v0  ;;  %v352_v4 = vld [vmem:[%s449_s2 + $0x38] sm:$0xff]   ;;  %v347_v5 = vld [vmem:[%s448_s1 + $0x20] sm:$0xff]   ;;  %v353_v6 = vld [vmem:[%s449_s2 + $0x30] sm:$0xff]   ;;  %v248_v24 = vand.u32 127, %v247_v23 }
   0x3   :  { %303 = vmatpush3.bf16.msra.mxu0 %v344_v1  ;;  %323 = vmatpush3.bf16.msra.mxu1 %v352_v4  ;;  %v348_v7 = vld [vmem:[%s448_s1 + $0x18] sm:$0xff]   ;;  %v354_v8 = vld [vmem:[%s449_s2 + $0x28] sm:$0xff]   ;;  %v349_v9 = vld [vmem:[%s448_s1 + $0x10] sm:$0xff]  }
   0x4   :  { %304 = vmatprep.subr.bf16.mxu0 %v364_v0  ;;  %324 = vmatprep.subr.bf16.mxu1 %v364_v0  ;;  %v355_v10 = vld [vmem:[%s449_s2 + $0x20] sm:$0xff]   ;;  %v350_v11 = vld [vmem:[%s448_s1 + $0x8] sm:$0xff]   ;;  %v356_v12 = vld [vmem:[%s449_s2 + $0x18] sm:$0xff]   ;;  %vm249_vm1 = vcmp.lt.s32.totalorder %v248_v24, 4 }
   0x5   :  { %v351_v13 = vld [vmem:[%s448_s1] sm:$0xff]   ;;  %v357_v14 = vld [vmem:[%s449_s2 + $0x10] sm:$0xff]   ;;  %v358_v16 = vld [vmem:[%s449_s2 + $0x8] sm:$0xff]  }
   0x6   :  { %v24_v15 = vld [vmem:[%s450_s0] sm:$0xf] }
   0x7   :  { %305 = vmatpush3.bf16.msra.mxu0 %v345_v2  ;;  %325 = vmatpush3.bf16.msra.mxu1 %v353_v6  ;;  %v359_v17 = vld [vmem:[%s449_s2] sm:$0xff]  }
   0x8   :  { %306 = vmatprep.subr.bf16.mxu0 %v364_v0  ;;  %326 = vmatprep.subr.bf16.mxu1 %v364_v0  ;;  %v275_v25 = vld [vmem:[%s451_s3] ss:$0 sm:$0xff] }
   0xb   :  { %307 = vmatpush3.bf16.msra.mxu0 %v346_v3  ;;  %327 = vmatpush3.bf16.msra.mxu1 %v354_v8 }
   0xc   :  { %308 = vmatprep.subr.bf16.mxu0 %v364_v0  ;;  %328 = vmatprep.subr.bf16.mxu1 %v364_v0 }
   0xf   :  { %309 = vmatpush3.bf16.msra.mxu0 %v347_v5  ;;  %329 = vmatpush3.bf16.msra.mxu1 %v355_v10 }
  0x10   :  { %310 = vmatprep.subr.bf16.mxu0 %v364_v0  ;;  %330 = vmatprep.subr.bf16.mxu1 %v364_v0 }
  0x13   :  { %311 = vmatpush3.bf16.msra.mxu0 %v348_v7  ;;  %331 = vmatpush3.bf16.msra.mxu1 %v356_v12 }
  0x14   :  { %312 = vmatprep.subr.bf16.mxu0 %v364_v0  ;;  %332 = vmatprep.subr.bf16.mxu1 %v364_v0 }
  0x17   :  { %313 = vmatpush3.bf16.msra.mxu0 %v349_v9  ;;  %333 = vmatpush3.bf16.msra.mxu1 %v357_v14 }
  0x18   :  { %314 = vmatprep.subr.bf16.mxu0 %v364_v0  ;;  %334 = vmatprep.subr.bf16.mxu1 %v364_v0 }
  0x1b   :  { %315 = vmatpush3.bf16.msra.mxu0 %v350_v11  ;;  %335 = vmatpush3.bf16.msra.mxu1 %v358_v16 }
  0x1c   :  { %316 = vmatprep.subr.bf16.mxu0 %v364_v0  ;;  %336 = vmatprep.subr.bf16.mxu1 %v364_v0 }
  0x1f   :  { %317 = vmatpush3.bf16.msra.mxu0 %v351_v13  ;;  %337 = vmatpush3.bf16.msra.mxu1 %v359_v17 }
  0x22   :  { %319 = vmatmul.mubr.bf16.vlgmr.msra.gmra.mxu0 %v24_v15 }
  0xe2   :  { %v123_v18 = vpop.f32.mrf.mxu0 }
  0xe3   :  { %v135_v19 = vpack.c.bf16 %v123_v18, %v123_v18 }
  0xe4   :  { %v320_v20 = vpop.f32.mrf.mxu0 }
  0xe5   :  { %339 = vmatmul.mubr.bf16.vlgmr.msra.gmra.mxu1 %v135_v19 }
  0xe6   :  { %v126_v21 = vpop.f32.mrf.mxu0 }
  0xe8   :  { %v321_v22 = vpop.f32.mrf.mxu0 }
 0x1a5   :  { %v241_v26 = vpop.f32.mrf.mxu1 }
 0x1a6   :  { %v242_v27 = vadd.f32 %v275_v25, %v241_v26 }
 0x1a7   :  { %v340_v28 = vpop.f32.mrf.mxu1 }
 0x1a8   :  { %v250_v29 = vsel %vm249_vm1, %v242_v27, -1e+30 }
 0x1a9   :  { %251 = vmax.xlane.f32.xlu0 %v250_v29  ;;  %v244_v30 = vpop.f32.mrf.mxu1 }
 0x1ab   :  { %v341_v31 = vpop.f32.mrf.mxu1 }
 0x232   :  { %v252_v32 = vpop.xlane.xlu0 %251 }
 0x233   :  { %v253_v33 = vsub.f32 %v250_v29, %v252_v32 }
 0x235   :  { %v254_v34 = vmul.f32 1.442695, %v253_v33 }
 0x237   :  { %360 = vpow2.f32 %v254_v34 }
 0x244   :  { %v361_v35 = vpop.eup %360 }
 0x245   :  { %v256_v36 = vsel %vm249_vm1, %v361_v35, 0.0 }
 0x246   :  { %257 = vadd.xlane.f32.xlu0 %v256_v36 }
 0x2cf   :  { %v258_v37 = vpop.xlane.xlu0 %257 }
 0x2d0   :  { %362 = vlog2.f32 %v258_v37 }
 0x2dd   :  { %v363_v38 = vpop.eup %362 }
 0x2de   :  { %v260_v39 = vmul.f32 0.6931472, %v363_v38 }
 0x2e0   :  { %v261_v40 = vsub.f32 %v253_v33, %v260_v39 }
 0x2e2   :  { %262 = vst [vmem:[%s452_s4] sm:$0xff] %v261_v40 }

</bundles_post_ra>
